<compile_context>
chip_gen: v5e
topology: v5e:2x2
jax: 0.10.0
libtpu: 0.0.40
codegen_flags: <defaults>
</compile_context>

<pallas_src>
import functools

import jax
import jax.numpy as jnp
import numpy as np
from jax.experimental import pallas as pl
from jax.experimental.pallas import tpu as pltpu


def _yolo_kernel(consts_ref, grid_ref, x_ref, o_ref, *, num_anchors, box_dim):
    """Decode one batch slab.

    consts_ref : VMEM f32[A*D, 5] per-row constants:
                   [:,0] sig_scale  (stride_h on c==0, stride_w on c==1,
                                     0 on c==2,3, 1 on c>=4)
                   [:,1] exp_gate   (1 on the h/w rows c==2,3, else 0)
                   [:,2] size_scale (anchor_h*stride_h on c==2,
                                     anchor_w*stride_w on c==3, else 0)
                   [:,3] sel_gx     (1 on c==0 rows, else 0)
                   [:,4] sel_gy     (1 on c==1 rows, else 0)
    grid_ref   : VMEM f32[2, HW]    [grid_x*stride_h ; grid_y*stride_w]
    x_ref      : VMEM f32[A*D, HW]  raw predictions for this batch
    o_ref      : VMEM f32[A, HW, D] decoded [bx, by, bh, bw, conf, cls...]
    """
    pred = x_ref[...]                              # (AD, HW)
    tbl = consts_ref[...]                          # (AD, 5)
    sig_scale = tbl[:, 0:1]                        # (AD, 1) broadcast over lanes
    exp_gate = tbl[:, 1:2]
    size_scale = tbl[:, 2:3]
    sel_gx = tbl[:, 3:4]
    sel_gy = tbl[:, 4:5]
    gx = grid_ref[0:1, :]                          # (1, HW), already * stride_h
    gy = grid_ref[1:2, :]                          # (1, HW), already * stride_w

    # Full-block, lane-dense compute (EUP for sigmoid/exp, VPU for the rest).
    sig = jax.nn.sigmoid(pred)                     # (AD, HW)
    # bh on c==2 rows, bw on c==3 rows, exactly 0 elsewhere (gate keeps exp finite).
    sizes = jnp.exp(pred * exp_gate) * size_scale  # (AD, HW)
    # Shift bh/bw up two sublanes so they align with the bx/by rows (c==0,1).
    # Rows that the wrap-around / spill-over lands on hold zeros in `sizes`,
    # so the shifted term only contributes on the c==0,1 rows.
    sizes_shifted = jnp.concatenate([sizes[2:, :], sizes[:2, :]], axis=0)

    decoded = (sig * sig_scale                     # sigmoid rows (x, y, conf, cls)
               + sizes                             # bh / bw rows
               + sel_gx * gx                       # + grid_x*stride_h on c==0
               + sel_gy * gy                       # + grid_y*stride_w on c==1
               - 0.5 * sizes_shifted)              # - bh/2, - bw/2 on c==0,1

    # Emit the module's (A, HW, D) layout directly: per-anchor (D, HW) -> (HW, D)
    # transpose on the XLU, one dense store per anchor.  This keeps the wrapper
    # reshape free (adjacent dim merge) and avoids a second HBM pass.
    D = box_dim
    for a in range(num_anchors):
        o_ref[a, :, :] = decoded[a * D:(a + 1) * D, :].T


def yolo_layer_forward(x, anchors, num_classes, img_height, img_width):
    """Pallas version of YOLOLayer.forward(x, targets=None).

    x: f32[B, A*(num_classes+5), H, W]  (NCHW, as in PyTorch)
    returns (output[B, A*H*W, 5+num_classes], 0, None)
    """
    B, c_tot, H, W = x.shape
    A = len(anchors)
    D = num_classes + 5
    assert c_tot == A * D, "channel dim must equal num_anchors * (num_classes + 5)"
    HW = H * W

    stride_h = float(img_height) / H
    stride_w = float(img_width) / W

    # Per-row constant table (host-side: strides / anchors / row selectors baked in).
    consts_np = np.zeros((A * D, 5), np.float32)
    for a, (a_w, a_h) in enumerate(anchors):      # anchors are (a_w, a_h) as in the module
        r = a * D
        consts_np[r + 0, 0] = stride_h            # bx: sig*stride_h + gx*stride_h - bh/2
        consts_np[r + 0, 3] = 1.0
        consts_np[r + 1, 0] = stride_w            # by: sig*stride_w + gy*stride_w - bw/2
        consts_np[r + 1, 4] = 1.0
        consts_np[r + 2, 1] = 1.0                 # bh: exp(h) * (a_h/stride_h) * stride_h
        consts_np[r + 2, 2] = (a_h / stride_h) * stride_h
        consts_np[r + 3, 1] = 1.0                 # bw: exp(w) * (a_w/stride_w) * stride_w
        consts_np[r + 3, 2] = (a_w / stride_w) * stride_w
        consts_np[r + 4:r + D, 0] = 1.0           # conf / cls: plain sigmoid
    consts = jnp.asarray(consts_np)

    # Cell offsets, pre-scaled by the strides (grid_x = row index, grid_y = col index).
    gx_np = np.broadcast_to(np.arange(H, dtype=np.float32)[:, None], (H, W)).reshape(1, HW) * stride_h
    gy_np = np.broadcast_to(np.arange(W, dtype=np.float32)[None, :], (H, W)).reshape(1, HW) * stride_w
    grid_xy = jnp.asarray(np.concatenate([gx_np, gy_np], axis=0).astype(np.float32))  # (2, HW)

    # (B, A*D, H, W) -> (B, A*D, HW): adjacent-dim merge, no data movement.
    x_r = x.astype(jnp.float32).reshape(B, A * D, HW)

    out = pl.pallas_call(
        functools.partial(_yolo_kernel, num_anchors=A, box_dim=D),
        out_shape=jax.ShapeDtypeStruct((B, A, HW, D), jnp.float32),
        grid=(B,),
        in_specs=[
            pl.BlockSpec((A * D, 5), lambda b: (0, 0)),        # per-row constants (resident)
            pl.BlockSpec((2, HW), lambda b: (0, 0)),           # pre-scaled cell offsets (resident)
            pl.BlockSpec((None, A * D, HW), lambda b: (b, 0, 0)),
        ],
        out_specs=pl.BlockSpec((None, A, HW, D), lambda b: (b, 0, 0, 0)),
        compiler_params=pltpu.CompilerParams(
            dimension_semantics=("parallel",),
            vmem_limit_bytes=32 * 1024 * 1024,
        ),
    )(consts, grid_xy, x_r)

    # (B, A, HW, D) -> (B, A*HW, D): adjacent-dim merge, no data movement.
    output = out.reshape(B, A * HW, D)
    # TODO(synk): training branch (build_targets + MSE/BCE losses + metrics) not implemented;
    # forward with targets=None returns (output, 0, None) exactly as the module does.
    return output, 0, None


def _yolo_reference(x, anchors, num_classes, img_height, img_width):
    """Pure-JAX transliteration of the PyTorch forward (targets=None) for checking."""
    B, _, H, W = x.shape
    A = len(anchors)
    D = num_classes + 5
    pred = x.reshape(B, A, D, H, W).transpose(0, 1, 3, 4, 2)  # (B, A, H, W, D)
    stride_h = float(img_height) / H
    stride_w = float(img_width) / W
    grid_x = jnp.broadcast_to(jnp.arange(H, dtype=jnp.float32)[:, None], (H, W))
    grid_y = jnp.broadcast_to(jnp.arange(W, dtype=jnp.float32)[None, :], (H, W))
    scaled = jnp.array(
        [(a_h / stride_h, a_w / stride_w) for (a_w, a_h) in anchors], jnp.float32
    )
    anchor_h = scaled[:, 0].reshape(1, A, 1, 1)
    anchor_w = scaled[:, 1].reshape(1, A, 1, 1)
    xs = jax.nn.sigmoid(pred[..., 0])
    ys = jax.nn.sigmoid(pred[..., 1])
    hh = pred[..., 2]
    ww = pred[..., 3]
    conf = jax.nn.sigmoid(pred[..., 4])
    cls = jax.nn.sigmoid(pred[..., 5:])
    bh = jnp.exp(hh) * anchor_h * stride_h
    bw = jnp.exp(ww) * anchor_w * stride_w
    bx = (xs + grid_x) * stride_h - bh / 2.0
    by = (ys + grid_y) * stride_w - bw / 2.0
    boxes = jnp.stack([bx, by, bh, bw], axis=-1)
    return jnp.concatenate(
        [
            boxes.reshape(B, -1, 4),
            conf.reshape(B, -1, 1),
            cls.reshape(B, -1, num_classes),
        ],
        axis=-1,
    )


if __name__ == "__main__":
    # Small, deterministic config.
    anchors = [(10.0, 13.0), (16.0, 30.0), (33.0, 23.0)]  # (a_w, a_h) pairs
    num_classes = 3                                       # -> D = 8 channels/anchor
    img_height, img_width = 128, 128
    B, H, W = 2, 16, 16
    A = len(anchors)
    D = num_classes + 5

    key = jax.random.PRNGKey(0)
    x = jax.random.normal(key, (B, A * D, H, W), dtype=jnp.float32)

    out, loss, metrics = yolo_layer_forward(x, anchors, num_classes, img_height, img_width)
    out = jax.block_until_ready(out)

    ref = _yolo_reference(x, anchors, num_classes, img_height, img_width)
    np.testing.assert_allclose(np.asarray(out), np.asarray(ref), rtol=1e-5, atol=1e-5)
    assert out.shape == (B, A * H * W, D)
    assert loss == 0 and metrics is None

    print("KERNEL_OK")
</pallas_src>

<mosaic_0001>
module attributes {stable_mosaic.version = 11 : i64} {
  func.func @_yolo_kernel(%arg0: i32, %arg1: memref<24x5xf32, #tpu.memory_space<vmem>>, %arg2: memref<2x256xf32, #tpu.memory_space<vmem>>, %arg3: memref<1x24x256xf32, #tpu.memory_space<vmem>>, %arg4: memref<1x3x256x8xf32, #tpu.memory_space<vmem>>) attributes {dimension_semantics = [#tpu.dimension_semantics<parallel>], iteration_bounds = array<i64: 2>, scalar_prefetch = 0 : i64, scratch_operands = 0 : i64, tpu.core_type = #tpu.core_type<tc>, window_params = [{pipeline_mode = #tpu.pipeline_mode<synchronous>, transform_indices = @transform_0, window_bounds = array<i64: 24, 5>}, {pipeline_mode = #tpu.pipeline_mode<synchronous>, transform_indices = @transform_1, window_bounds = array<i64: 2, 256>}, {transform_indices = @transform_2, window_bounds = array<i64: 1, 24, 256>}, {transform_indices = @transform_3, window_bounds = array<i64: 1, 3, 256, 8>}]} {
    %c0 = arith.constant 0 : index
    %c0_0 = arith.constant 0 : index
    %c0_1 = arith.constant 0 : index
    %0 = vector.load %arg3[%c0, %c0_0, %c0_1] : memref<1x24x256xf32, #tpu.memory_space<vmem>>, vector<1x24x256xf32>
    %1 = vector.shape_cast %0 : vector<1x24x256xf32> to vector<24x256xf32>
    %c0_2 = arith.constant 0 : index
    %c0_3 = arith.constant 0 : index
    %2 = vector.load %arg1[%c0_2, %c0_3] : memref<24x5xf32, #tpu.memory_space<vmem>>, vector<24x5xf32>
    %3 = vector.extract_strided_slice %2 {offsets = [0, 0], sizes = [24, 1], strides = [1, 1]} : vector<24x5xf32> to vector<24x1xf32>
    %4 = vector.extract_strided_slice %2 {offsets = [0, 1], sizes = [24, 1], strides = [1, 1]} : vector<24x5xf32> to vector<24x1xf32>
    %5 = vector.extract_strided_slice %2 {offsets = [0, 2], sizes = [24, 1], strides = [1, 1]} : vector<24x5xf32> to vector<24x1xf32>
    %6 = vector.extract_strided_slice %2 {offsets = [0, 3], sizes = [24, 1], strides = [1, 1]} : vector<24x5xf32> to vector<24x1xf32>
    %7 = vector.extract_strided_slice %2 {offsets = [0, 4], sizes = [24, 1], strides = [1, 1]} : vector<24x5xf32> to vector<24x1xf32>
    %c0_4 = arith.constant 0 : index
    %c0_5 = arith.constant 0 : index
    %8 = vector.load %arg2[%c0_4, %c0_5] : memref<2x256xf32, #tpu.memory_space<vmem>>, vector<1x256xf32>
    %c1 = arith.constant 1 : index
    %c0_6 = arith.constant 0 : index
    %9 = vector.load %arg2[%c1, %c0_6] : memref<2x256xf32, #tpu.memory_space<vmem>>, vector<1x256xf32>
    %10 = arith.negf %1 : vector<24x256xf32>
    %11 = math.exp %10 : vector<24x256xf32>
    %cst = arith.constant 1.000000e+00 : f32
    %12 = vector.broadcast %cst : f32 to vector<24x256xf32>
    %13 = arith.addf %12, %11 : vector<24x256xf32>
    %14 = arith.divf %12, %13 : vector<24x256xf32>
    %15 = vector.broadcast %4 : vector<24x1xf32> to vector<24x256xf32>
    %16 = arith.mulf %1, %15 : vector<24x256xf32>
    %17 = math.exp %16 : vector<24x256xf32>
    %18 = vector.broadcast %5 : vector<24x1xf32> to vector<24x256xf32>
    %19 = arith.mulf %17, %18 : vector<24x256xf32>
    %20 = vector.extract_strided_slice %19 {offsets = [2, 0], sizes = [22, 256], strides = [1, 1]} : vector<24x256xf32> to vector<22x256xf32>
    %21 = vector.extract_strided_slice %19 {offsets = [0, 0], sizes = [2, 256], strides = [1, 1]} : vector<24x256xf32> to vector<2x256xf32>
    %22 = tpu.concatenate %20, %21 in 0 : vector<22x256xf32>, vector<2x256xf32> -> vector<24x256xf32>
    %23 = vector.broadcast %3 : vector<24x1xf32> to vector<24x256xf32>
    %24 = arith.mulf %14, %23 : vector<24x256xf32>
    %25 = arith.addf %24, %19 : vector<24x256xf32>
    %26 = vector.broadcast %6 : vector<24x1xf32> to vector<24x256xf32>
    %27 = vector.broadcast %8 : vector<1x256xf32> to vector<24x256xf32>
    %28 = arith.mulf %26, %27 : vector<24x256xf32>
    %29 = arith.addf %25, %28 : vector<24x256xf32>
    %30 = vector.broadcast %7 : vector<24x1xf32> to vector<24x256xf32>
    %31 = vector.broadcast %9 : vector<1x256xf32> to vector<24x256xf32>
    %32 = arith.mulf %30, %31 : vector<24x256xf32>
    %33 = arith.addf %29, %32 : vector<24x256xf32>
    %cst_7 = arith.constant 5.000000e-01 : f32
    %34 = vector.broadcast %cst_7 : f32 to vector<24x256xf32>
    %35 = arith.mulf %34, %22 : vector<24x256xf32>
    %36 = arith.subf %33, %35 : vector<24x256xf32>
    %37 = vector.extract_strided_slice %36 {offsets = [0, 0], sizes = [8, 256], strides = [1, 1]} : vector<24x256xf32> to vector<8x256xf32>
    %38 = tpu.transpose %37, [1, 0] : vector<8x256xf32> -> vector<256x8xf32>
    %c0_8 = arith.constant 0 : index
    %c0_9 = arith.constant 0 : index
    %c0_10 = arith.constant 0 : index
    %c0_11 = arith.constant 0 : index
    %39 = vector.load %arg4[%c0_8, %c0_9, %c0_10, %c0_11] : memref<1x3x256x8xf32, #tpu.memory_space<vmem>>, vector<1x1x256x8xf32>
    %40 = vector.shape_cast %39 : vector<1x1x256x8xf32> to vector<256x8xf32>
    %41 = vector.shape_cast %38 : vector<256x8xf32> to vector<1x1x256x8xf32>
    tpu.vector_store %arg4[%c0_8, %c0_9, %c0_10, %c0_11], %41 {strides = array<i32>} : memref<1x3x256x8xf32, #tpu.memory_space<vmem>>, vector<1x1x256x8xf32>,
    %42 = vector.extract_strided_slice %36 {offsets = [8, 0], sizes = [8, 256], strides = [1, 1]} : vector<24x256xf32> to vector<8x256xf32>
    %43 = tpu.transpose %42, [1, 0] : vector<8x256xf32> -> vector<256x8xf32>
    %c0_12 = arith.constant 0 : index
    %c1_13 = arith.constant 1 : index
    %c0_14 = arith.constant 0 : index
    %c0_15 = arith.constant 0 : index
    %44 = vector.load %arg4[%c0_12, %c1_13, %c0_14, %c0_15] : memref<1x3x256x8xf32, #tpu.memory_space<vmem>>, vector<1x1x256x8xf32>
    %45 = vector.shape_cast %44 : vector<1x1x256x8xf32> to vector<256x8xf32>
    %46 = vector.shape_cast %43 : vector<256x8xf32> to vector<1x1x256x8xf32>
    tpu.vector_store %arg4[%c0_12, %c1_13, %c0_14, %c0_15], %46 {strides = array<i32>} : memref<1x3x256x8xf32, #tpu.memory_space<vmem>>, vector<1x1x256x8xf32>,
    %47 = vector.extract_strided_slice %36 {offsets = [16, 0], sizes = [8, 256], strides = [1, 1]} : vector<24x256xf32> to vector<8x256xf32>
    %48 = tpu.transpose %47, [1, 0] : vector<8x256xf32> -> vector<256x8xf32>
    %c0_16 = arith.constant 0 : index
    %c2 = arith.constant 2 : index
    %c0_17 = arith.constant 0 : index
    %c0_18 = arith.constant 0 : index
    %49 = vector.load %arg4[%c0_16, %c2, %c0_17, %c0_18] : memref<1x3x256x8xf32, #tpu.memory_space<vmem>>, vector<1x1x256x8xf32>
    %50 = vector.shape_cast %49 : vector<1x1x256x8xf32> to vector<256x8xf32>
    %51 = vector.shape_cast %48 : vector<256x8xf32> to vector<1x1x256x8xf32>
    tpu.vector_store %arg4[%c0_16, %c2, %c0_17, %c0_18], %51 {strides = array<i32>} : memref<1x3x256x8xf32, #tpu.memory_space<vmem>>, vector<1x1x256x8xf32>,
    return
  }
  func.func @transform_0(%arg0: i32) -> (i32, i32) {
    %c0_i32 = arith.constant 0 : i32
    %c0_i32_0 = arith.constant 0 : i32
    %c0_i32_1 = arith.constant 0 : i32
    return %c0_i32, %c0_i32_0 : i32, i32
  }
  func.func @transform_1(%arg0: i32) -> (i32, i32) {
    %c0_i32 = arith.constant 0 : i32
    %c0_i32_0 = arith.constant 0 : i32
    %c0_i32_1 = arith.constant 0 : i32
    return %c0_i32, %c0_i32_0 : i32, i32
  }
  func.func @transform_2(%arg0: i32) -> (i32, i32, i32) {
    %c0_i32 = arith.constant 0 : i32
    %c0_i32_0 = arith.constant 0 : i32
    %c0_i32_1 = arith.constant 0 : i32
    return %arg0, %c0_i32, %c0_i32_0 : i32, i32, i32
  }
  func.func @transform_3(%arg0: i32) -> (i32, i32, i32, i32) {
    %c0_i32 = arith.constant 0 : i32
    %c0_i32_0 = arith.constant 0 : i32
    %c0_i32_1 = arith.constant 0 : i32
    %c0_i32_2 = arith.constant 0 : i32
    return %arg0, %c0_i32, %c0_i32_0, %c0_i32_1 : i32, i32, i32, i32
  }
}

</mosaic_0001>

<bundles_post_ra>
// kernel: tpu_custom_call.1
= control target key start
LH: loop header
LB: loop body
LE: loop exit
PB: predicated region body
PF: predicated region fallthrough
CT: control target
= control target key end

     0   :  { %8 = vsyncpa [#allocation3], 0  ;;  %s1649_s0 = inlined_call_operand.vmem [shape: f32[24,5], index: 0, kind: input, shape index: {}]   ;;  %s1650_s1 = inlined_call_operand.vmem [shape: f32[2,256], index: 1, kind: input, shape index: {}]   ;;  %s1651_s2 = inlined_call_operand.hbm [shape: f32[2,24,256], index: 2, kind: input, shape index: {}]   ;;  %s1652_s3 = inlined_call_operand.vmem [shape: f32[2,3,256,8], index: 3, kind: output, shape index: {}]  }
   0x1   :  { %10 = vsyncpa [#allocation3 + $0x1], 0  ;;  %s1121_s12 = smov 0   ;;  %s1123_s13 = smov 0  }
   0x2   :  { %s1125_s14 = smov 0   ;;  %s1127_s15 = smov 0  }
   0x3 LB: > { %s1140_s16 = sadd.s32 4294967295, %s1092_s15   ;;  %s1143_s17 = sadd.s32 1, %s1092_s15   ;;  %s1092_s15 = sphi %s1127_s15, %s1672_s15   ;;  %s1088_s14 = sphi %s1125_s14, %s1671_s14   ;;  %s1084_s13 = sphi %s1123_s13, %s1670_s13   ;;  %s1080_s12 = sphi %s1121_s12, %s1669_s12  }
   0x4   : > { %s62_s18 = ssub.s32 %s1092_s15, %s1143_s17  ;;  %s65_s19 = sadd.s32 1, %s1088_s14 }
   0x5   : > { %p63_p0 = scmp.eq.s32.totalorder %s62_s18, 0  ;;  %p72_p1 = scmp.ne.s32.totalorder %s1088_s14, %s1084_s13 }
   0x6   : > { %p73_p2 = scmp.eq.s32.totalorder %s1092_s15, 0  ;;  %p78_p3 = scmp.ne.s32.totalorder %s1084_s13, %s1080_s12 }
   0x7   : > { %s1153_s20 = scalar_select %p63_p0, %s1088_s14, %s65_s19  }
   0x8   : > { %p74_p4 = por %p73_p2, %p72_p1  ;;  %p79_p5 = scmp.eq.s32.totalorder %s1140_s16, 0 }
   0x9   : > { %p938_p6 = scmp.lt.s32.totalorder %s1092_s15, 2  ;;  %s134_s22 = sand.u32 1, %s1088_s14  }
   0xa   : > { %p1157_p7 = por %p79_p5, %p78_p3  ;;  %s928_s23 = smul.u32 48, %s134_s22 }
   0xb   : > { %s929_s24 = smul.u32 48, %s1092_s15  ;;  %p1163_p8 = pnand %p938_p6, %p74_p4 }
   0xc   : > { %s138_s29 = scalar_lea.vmem [#allocation2], %s928_s23  ;;  %p853_p9 = scmp.ge.s32.totalorder %s1092_s15, 1 }
   0xd   : > { %s143_s28 = scalar_lea.hbm %s1651_s2, %s929_s24  ;;  %s146_s30 = sshll.u32 %s138_s29, 4  ;;  %s147_s30 = int_to_ptr.vmem [resolvable:$true] %s146_s30 }
   0xe   : > { %s144_s4 = sshll.u32 %s143_s28, 4  ;;  %s135_s5 = scalar_lea.sflag [#allocation3], %s134_s22  ;;  %s145_s4 = int_to_ptr.hbm [resolvable:$true] %s144_s4 }
   0xf   : > { %s1028_s6 = sshra.s32 %s145_s4, 4  ;;  %p1032_p11 = pneg %p1163_p8  ;;  %s1029_s6 = int_to_ptr.hbm [resolvable:$true] %s1028_s6 }
  0x10   : > { %s1030_s7 = scalar_lea.hbm %s1029_s6, 48  ;;  %s1035_s10 = scalar_lea.hbm %s1651_s2, 96 }
  0x11   : > { %p1031_p10 = scmp.ne.s32.totalorder %s1029_s6, %s1030_s7  ;;  %p1036_p0 = scmp.lt.s32.totalorder %s1029_s6, %s1651_s2 }
  0x12   : > { %p1037_p1 = scmp.lt.s32.totalorder %s1035_s10, %s1030_s7 }
  0x13   : > { %p1033_p12 = pnand %p1032_p11, %p1031_p10 }
  0x14   : > { %p1038_p2 = por %p1037_p1, %p1036_p0 }
  0x15   : > { %p1034_p13 = pneg %p1033_p12 }
  0x17   : > { %p1039_p3 = pnand %p1038_p2, %p1034_p13 }
  0x19   : > { %1042 = shalt.err (!%p1039_p3)
}
  0x1a   : > { %s1094_s18 = smov 256   ;;  %s1095_s19 = smov 16  }
  0x1b   : > { %937 = dma.hbm_to_vmem [thread:$0]  (!%p1163_p8), %s145_s4, 768, %s147_s30, %s135_s5, %s1094_s18, %s1094_s18, %s1095_s19  }
  0x1c   : > { %p154_p4 = scmp.lt.s32.totalorder %s1092_s15, 3 }
  0x1e   : > { %p155_p5 = pnand %p853_p9, %p154_p4 }
  0x1f   : > { %s160_s22 = sand.u32 (!%p155_p5), 1, %s1084_s13  }
  0x20   : > { %158 = sbr.rel (%p155_p5) target bundleno = 611 (0x263), region = 32  ;;  %s161_s24 = scalar_lea.sflag (!%p155_p5), [#allocation3], %s160_s22 }
  0x21   : > { %s930_s23 = smul.u32 (!%p155_p5), 48, %s160_s22 }
  0x23   : > { %s1185_s26 = scalar_lea.vmem (!%p155_p5), [#allocation2], %s930_s23 }
  0x25   : > { %1075 = dma.done.wait (%p1157_p7), %s161_s24, 768  }
  0x26   : > { %1077 = vsyncadd (%p1157_p7), %s161_s24, 4294966528  ;;  %v1096_v0 = vmov 1   ;;  %v1097_v1 = vmov 2   ;;  %v201_v2 = vld [vmem:[%s1649_s0 + $0x10] sm:$0xff]  ;;  %v199_v3 = vld [vmem:[%s1649_s0] sm:$0xff]  ;;  %v1098_v5 = vmov 0  }
  0x27   : > { %980 = vset.pattern.permute.xlu1 %v1096_v0  ;;  %979 = vset.pattern.permute.xlu0 %v1096_v0  ;;  %v200_v4 = vld [vmem:[%s1649_s0 + $0x8] sm:$0xff]  ;;  %v1099_v6 = vmov 3   ;;  %v1100_v7 = vmov 4   ;;  %v1203_v8 = vld [vmem:[%s1185_s26 + $0x20] sm:$0xff]  ;;  %v1211_v14 = vld [vmem:[%s1185_s26 + $0x10] sm:$0xff]  ;;  %p188_p6 = scmp.lt.s32.totalorder %s1140_s16, 1 }
  0x28   : > { %982 = vset.pattern.permute.xlu2 %v1097_v1  ;;  %331 = vperm.xlu1 %980, %v201_v2   ;;  %v860_v9 = vmul.f32 -1.442695, %v1203_v8  ;;  %v1207_v10 = vld [vmem:[%s1185_s26 + $0x28] sm:$0xff]  ;;  %v1214_v15 = vld [vmem:[%s1185_s26 + $0x18] sm:$0xff]  ;;  %v1217_v16 = vld [vmem:[%s1185_s26] sm:$0xff] }
  0x29   : > { %321 = vperm.xlu0 %979, %v199_v3   ;;  %357 = vperm.xlu2 %982, %v200_v4   ;;  %v861_v12 = vmul.f32 -1.442695, %v1207_v10  ;;  %v858_v17 = vmul.f32 -1.442695, %v1211_v14  ;;  %v1221_v19 = vld [vmem:[%s1185_s26 + $0x8] sm:$0xff]  ;;  %s1674_s16 = smov (!%p188_p6, %s1140_s16), 1 }
  0x2a   : > { %992 = vpow2.f32 %v860_v9  ;;  %v859_v20 = vmul.f32 -1.442695, %v1214_v15  ;;  %v856_v22 = vmul.f32 -1.442695, %v1217_v16  ;;  %v857_v23 = vmul.f32 -1.442695, %v1221_v19 }
  0x2b   : > { %994 = vpow2.f32 %v861_v12  ;;  %v1272_v56 = vld [vmem:[%s1650_s1] ss:$2 sm:$0x3]  ;;  %s931_s7 = smul.u32 768, %s1674_s16 }
  0x2c   : > { %v1284_v0 = vperm.slane %v1272_v56, 1 }
  0x2d   : > { %s1441_s10 = scalar_lea.vmem %s1652_s3, %s931_s7 }
  0x30   : > { %981 = vset.pattern.permute.xlu1 %v1097_v1  ;;  %v993_v11 = vpop.eup %992 }
  0x31   : > { %326 = vperm.xlu0 %979, %v200_v4   ;;  %353 = vperm.xlu1 %981, %v199_v3   ;;  %v227_v13 = vadd.f32 1.0, %v993_v11  ;;  %v995_v18 = vpop.eup %994 }
  0x32   : > { %361 = vperm.xlu2 %982, %v201_v2   ;;  %v1226_v24 = vadd.f32 1.0, %v995_v18 }
  0x33   : > { %996 = vrcp.f32 %v227_v13  ;;  %vm294_vm0 = vweird.f32 %v227_v13  ;;  %v300_v37 = vand.u32 2147483648, %v227_v13  ;;  %v298_v40 = vand.u32 2147483647, %v227_v13 }
  0x34   : > { %998 = vpow2.f32 %v858_v17  ;;  %vm309_vm4 = vweird.f32 %v1226_v24  ;;  %v313_v57 = vand.u32 2147483647, %v1226_v24  ;;  %v315_v58 = vand.u32 2147483648, %v1226_v24 }
  0x35   : > { %1000 = vpow2.f32 %v859_v20  ;;  %v301_v43 = vor.u32 1.1754944e-38, %v300_v37  ;;  %vm299_vm3 = vcmp.eq.f32.partialorder %v298_v40, 8.507059e+37 }
  0x36   : > { %1002 = vpow2.f32 %v856_v22  ;;  %vm314_vm7 = vcmp.eq.f32.partialorder %v313_v57, 8.507059e+37  ;;  %v316_v11 = vor.u32 1.1754944e-38, %v315_v58 }
  0x37   : > { %1004 = vpow2.f32 %v857_v23 }
  0x38   : > { %1006 = vrcp.f32 %v1226_v24 }
  0x39   : > { %983 = vset.pattern.permute.xlu0 %v1098_v5  ;;  %984 = vset.pattern.permute.xlu1 %v1098_v5  ;;  %v997_v21 = vpop.eup %996 }
  0x3a   : > { %398 = vperm.xlu0 %983, %v199_v3   ;;  %402 = vperm.xlu1 %984, %v200_v4   ;;  %v290_v25 = vmul.f32 %v997_v21, %v227_v13  ;;  %v999_v28 = vpop.eup %998  ;;  %vm295_vm1 = vweird.f32 %v997_v21 }
  0x3b   : > { %985 = vset.pattern.permute.xlu2 %v1098_v5  ;;  %v1001_v29 = vpop.eup %1000  ;;  %v1231_v32 = vadd.f32 1.0, %v999_v28  ;;  %vm296_vm2 = vmor %vm294_vm0, %vm295_vm1  ;;  %vm376_vm0 = vcmask 1045504  }
  0x3c   : > { %406 = vperm.xlu2 %985, %v201_v2   ;;  %v291_v27 = vsub.f32 1.0, %v290_v25  ;;  %v1003_v30 = vpop.eup %1002  ;;  %v1233_v34 = vadd.f32 1.0, %v1001_v29 }
  0x3d   : > { %v1005_v33 = vpop.eup %1004  ;;  %v1239_v38 = vadd.f32 1.0, %v1003_v30  ;;  %1008 = vrcp.f32 %v1231_v32  ;;  %vm264_vm8 = vweird.f32 %v1231_v32  ;;  %v270_v28 = vand.u32 2147483648, %v1231_v32 }
  0x3e   : > { %v292_v31 = vmul.f32 %v997_v21, %v291_v27  ;;  %v1235_v35 = vpop.eup %1006  ;;  %v1242_v41 = vadd.f32 1.0, %v1005_v33  ;;  %1010 = vrcp.f32 %v1233_v34  ;;  %vm279_vm10 = vweird.f32 %v1233_v34 }
  0x3f   : > { %v305_v42 = vmul.f32 %v1235_v35, %v1226_v24  ;;  %1012 = vrcp.f32 %v1239_v38  ;;  %vm310_vm5 = vweird.f32 %v1235_v35  ;;  %v268_v24 = vand.u32 2147483647, %v1231_v32 }
  0x40   : > { %v293_v39 = vadd.f32 %v997_v21, %v292_v31  ;;  %1014 = vrcp.f32 %v1242_v41  ;;  %vm1279_vm6 = vmor %vm309_vm4, %vm310_vm5  ;;  %v285_v29 = vand.u32 2147483648, %v1233_v34  ;;  %vm234_vm1 = vweird.f32 %v1239_v38 }
  0x41   : > { %v306_v45 = vsub.f32 1.0, %v305_v42  ;;  %v240_v42 = vand.u32 2147483648, %v1239_v38  ;;  %vm1331_vm14 = vcmp.eq.f32.partialorder %v268_v24, 8.507059e+37  ;;  %v238_v24 = vand.u32 2147483647, %v1239_v38 }
  0x42   : > { %988 = vset.pattern.permute.xlu0 %v1099_v6  ;;  %986 = vset.pattern.permute.xlu1 %v1099_v6  ;;  %v297_v44 = vsel %vm296_vm2, %v997_v21, %v293_v39  ;;  %v283_v39 = vand.u32 2147483647, %v1233_v34  ;;  %v286_v57 = vor.u32 1.1754944e-38, %v285_v29  ;;  %v253_v29 = vand.u32 2147483647, %v1242_v41 }
  0x43   : > { %430 = vperm.xlu0 %988, %v201_v2   ;;  %422 = vperm.xlu1 %986, %v199_v3   ;;  %v1249_v46 = vpop.eup %1008  ;;  %v302_v48 = vsel %vm299_vm3, %v301_v43, %v297_v44  ;;  %v307_v50 = vmul.f32 %v1235_v35, %v306_v45  ;;  %vm249_vm3 = vweird.f32 %v1242_v41 }
  0x44   : > { %987 = vset.pattern.permute.xlu2 %v1099_v6  ;;  %v1251_v47 = vpop.eup %1010  ;;  %v260_v53 = vmul.f32 %v1249_v46, %v1231_v32  ;;  %vm265_vm9 = vweird.f32 %v1249_v46  ;;  %vm284_vm15 = vcmp.eq.f32.partialorder %v283_v39, 8.507059e+37 }
  0x45   : > { %426 = vperm.xlu2 %987, %v200_v4   ;;  %v1256_v51 = vpop.eup %1012  ;;  %v275_v54 = vmul.f32 %v1251_v47, %v1233_v34  ;;  %v308_v59 = vadd.f32 %v1235_v35, %v307_v50  ;;  %vm280_vm11 = vweird.f32 %v1251_v47  ;;  %vm1313_vm12 = vmor %vm264_vm8, %vm265_vm9  ;;  %vm254_vm8 = vcmp.eq.f32.partialorder %v253_v29, 8.507059e+37 }
  0x46   : > { %v1265_v55 = vpop.eup %1014  ;;  %v230_v60 = vmul.f32 %v1256_v51, %v1239_v38  ;;  %vm1326_vm13 = vmor %vm279_vm10, %vm280_vm11  ;;  %vm235_vm2 = vweird.f32 %v1256_v51  ;;  %vm555_vm9 = vcmask 64512  }
  0x47   : > { %v245_v1 = vmul.f32 %v1265_v55, %v1242_v41  ;;  %v312_v18 = vsel %vm1279_vm6, %v1235_v35, %v308_v59  ;;  %vm250_vm4 = vweird.f32 %v1265_v55  ;;  %vm1384_vm5 = vmor %vm234_vm1, %vm235_vm2 }
  0x48   : > { %v231_v22 = vsub.f32 1.0, %v230_v60  ;;  %v317_v23 = vsel %vm314_vm7, %v316_v11, %v312_v18  ;;  %vm1398_vm6 = vmor %vm249_vm3, %vm250_vm4  ;;  %vm1407_vm7 = vcmp.eq.f32.partialorder %v238_v24, 8.507059e+37 }
  0x4a   : > { %v232_v40 = vmul.f32 %v1256_v51, %v231_v22 }
  0x4b   : > { %989 = vset.pattern.permute.xlu1 %v1100_v7 }
  0x4c   : > { %451 = vperm.xlu1 %989, %v199_v3   ;;  %v276_v3 = vsub.f32 1.0, %v275_v54  ;;  %v271_v54 = vor.u32 1.1754944e-38, %v270_v28 }
  0x4d   : > { %990 = vset.pattern.permute.xlu2 %v1100_v7 }
  0x4e   : > { %455 = vperm.xlu2 %990, %v200_v4  }
  0x54   : > { %459 = vperm.xlu1 %989, %v201_v2   ;;  %v261_v2 = vsub.f32 1.0, %v260_v53 }
  0x83   : > { %v1228_v26 = vpop.permute.xlu2 %357 }
  0x8c   : > { %v1237_v36 = vpop.permute.xlu2 %361 }
  0x96   : > { %v1253_v49 = vpop.permute.xlu2 %406 }
  0x97   : > { %v1259_v52 = vmul.f32 %v1253_v49, %v302_v48  ;;  %v414_v43 = vmul.f32 %v1253_v49, %v317_v23 }
  0x9a   : > { %v332_v61 = vpop.permute.xlu1 %331 }
  0x9b   : > { %v322_v62 = vpop.permute.xlu0 %321  ;;  %v338_v4 = vmul.f32 %v332_v61, %v1203_v8  ;;  %v339_v5 = vmul.f32 %v332_v61, %v1207_v10  ;;  %v262_v8 = vmul.f32 %v1249_v46, %v261_v2  ;;  %v855_v2 = vld [vmem:[%s1650_s1 + $0x1] ss:$2 sm:$0x3] }
  0x9c   : > { %v334_v6 = vmul.f32 %v322_v62, %v1217_v16  ;;  %v335_v9 = vmul.f32 %v322_v62, %v1221_v19  ;;  %v246_v16 = vsub.f32 1.0, %v245_v1  ;;  %v277_v19 = vmul.f32 %v1251_v47, %v276_v3 }
  0x9d   : > { %v348_v12 = vmul.f32 1.442695, %v338_v4  ;;  %v350_v13 = vmul.f32 1.442695, %v339_v5  ;;  %v263_v27 = vadd.f32 %v1249_v46, %v262_v8  ;;  %v434_v3 = vperm.slane %v1272_v56, 0 }
  0x9e   : > { %v340_v17 = vmul.f32 1.442695, %v334_v6  ;;  %v342_v20 = vmul.f32 1.442695, %v335_v9  ;;  %v278_v37 = vadd.f32 %v1251_v47, %v277_v19  ;;  %v247_v32 = vmul.f32 %v1265_v55, %v246_v16 }
  0x9f   : > { %v1295_v21 = vpop.permute.xlu2 %426  ;;  %1016 = vpow2.f32 %v348_v12  ;;  %v267_v34 = vsel %vm1313_vm12, %v1249_v46, %v263_v27  ;;  %v233_v9 = vadd.f32 %v1256_v51, %v232_v40  ;;  %v1367_v12 = vperm.slane %v855_v2, 0 }
  0xa0   : > { %v1300_v10 = vmul.f32 %v1284_v0, %v1295_v21  ;;  %1018 = vpow2.f32 %v350_v13  ;;  %v282_v49 = vsel %vm1326_vm13, %v1251_v47, %v278_v37  ;;  %v440_v19 = vmul.f32 %v434_v3, %v1295_v21 }
  0xa1   : > { %1020 = vpow2.f32 %v340_v17  ;;  %v287_v4 = vsel %vm284_vm15, %v286_v57, %v282_v49  ;;  %v248_v28 = vadd.f32 %v1265_v55, %v247_v32  ;;  %v237_v37 = vsel %vm1384_vm5, %v1256_v51, %v233_v9 }
  0xa2   : > { %1022 = vpow2.f32 %v342_v20  ;;  %v1374_v20 = vperm.slane %v855_v2, 1 }
  0xa3   : > { %v327_v25 = vpop.permute.xlu0 %326  ;;  %v354_v33 = vpop.permute.xlu1 %353 }
  0xa4   : > { %v336_v30 = vmul.f32 %v327_v25, %v1211_v14  ;;  %v337_v31 = vmul.f32 %v327_v25, %v1214_v15  ;;  %v255_v25 = vand.u32 2147483648, %v1242_v41 }
  0xa5   : > { %v1017_v15 = vpop.eup %1016 }
  0xa6   : > { %v344_v44 = vmul.f32 1.442695, %v336_v30  ;;  %v346_v45 = vmul.f32 1.442695, %v337_v31  ;;  %v1019_v50 = vpop.eup %1018  ;;  %v368_v53 = vmul.f32 %v1017_v15, %v1237_v36  ;;  %v241_v31 = vor.u32 1.1754944e-38, %v240_v42 }
  0xa7   : > { %v1021_v58 = vpop.eup %1020  ;;  %v1340_v59 = vmul.f32 %v1019_v50, %v1237_v36  ;;  %v256_v41 = vor.u32 1.1754944e-38, %v255_v25  ;;  %v252_v15 = vsel %vm1398_vm6, %v1265_v55, %v248_v28 }
  0xa8   : > { %1024 = vpow2.f32 %v344_v44  ;;  %v1023_v60 = vpop.eup %1022  ;;  %v383_v61 = vrot.slane %v368_v53, 2  ;;  %v1346_v62 = vadd.f32 %v1259_v52, %v368_v53  ;;  %v1348_v63 = vmul.f32 %v1021_v58, %v354_v33  ;;  %v456_v22 = vpop.permute.xlu2 %455 }
  0xa9   : > { %1026 = vpow2.f32 %v346_v45  ;;  %v385_v46 = vrot.slane %v1340_v59, 2  ;;  %v420_v1 = vadd.f32 %v414_v43, %v1340_v59  ;;  %v1352_v36 = vmul.f32 %v1023_v60, %v354_v33 }
  0xaa   : > { %v377_v47 = vrot.slane %v1348_v63, 2  ;;  %v272_v52 = vsel %vm1331_vm14, %v271_v54, %v267_v34  ;;  %v469_v35 = vmul.f32 %v1367_v12, %v456_v22  ;;  %v242_v58 = vsel %vm1407_vm7, %v241_v31, %v237_v37 }
  0xab   : > { %v380_v5 = vrot.slane %v1352_v36, 2  ;;  %v257_v59 = vsel %vm254_vm8, %v256_v41, %v252_v15 }
  0xac   : > { %v399_v6 = vpop.permute.xlu0 %398  ;;  %v403_v11 = vpop.permute.xlu1 %402  ;;  %v1372_v56 = vsel %vm376_vm0, %v383_v61, %v377_v47 }
  0xad   : > { %v411_v17 = vmul.f32 %v403_v11, %v272_v52  ;;  %v412_v18 = vmul.f32 %v403_v11, %v287_v4  ;;  %v1379_v8 = vsel %vm376_vm0, %v385_v46, %v380_v5  ;;  %v410_v2 = vmul.f32 %v399_v6, %v257_v59 }
  0xae   : > { %v1025_v13 = vpop.eup %1024  ;;  %v484_v25 = vmul.f32 0.5, %v1379_v8 }
  0xaf   : > { %v1027_v16 = vpop.eup %1026  ;;  %v366_v27 = vmul.f32 %v1025_v13, %v1228_v26  ;;  %v416_v9 = vadd.f32 %v410_v2, %v1352_v36 }
  0xb0   : > { %v367_v30 = vmul.f32 %v1027_v16, %v1228_v26  ;;  %v470_v26 = vmul.f32 %v1374_v20, %v456_v22 }
  0xb1   : > { %v378_v38 = vrot.slane %v366_v27, 2  ;;  %v417_v33 = vadd.f32 %v411_v17, %v366_v27  ;;  %v483_v27 = vmul.f32 0.5, %v1372_v56 }
  0xb2   : > { %v381_v39 = vrot.slane %v367_v30, 2  ;;  %v418_v40 = vadd.f32 %v412_v18, %v367_v30 }
  0xb3   : > { %v446_v32 = vadd.f32 %v440_v19, %v417_v33  ;;  %v384_v14 = vsel %vm376_vm0, %v378_v38, %v383_v61  ;;  %v409_v61 = vmul.f32 %v399_v6, %v242_v58 }
  0xb4   : > { %v447_v43 = vadd.f32 %v1300_v10, %v418_v40  ;;  %v481_v51 = vmul.f32 0.5, %v384_v14  ;;  %v386_v48 = vsel %vm376_vm0, %v381_v39, %v385_v46  ;;  %v382_v13 = vsel %vm376_vm0, %v380_v5, %v381_v39 }
  0xb5   : > { %v475_v44 = vadd.f32 %v469_v35, %v446_v32  ;;  %v431_v45 = vpop.permute.xlu0 %430  ;;  %v423_v54 = vpop.permute.xlu1 %422  ;;  %v482_v57 = vmul.f32 0.5, %v386_v48  ;;  %v415_v4 = vadd.f32 %v409_v61, %v1348_v63  ;;  %v480_v22 = vmul.f32 0.5, %v382_v13 }
  0xb6   : > { %v476_v50 = vadd.f32 %v470_v26, %v447_v43  ;;  %v442_v53 = vmul.f32 %v434_v3, %v431_v45  ;;  %v443_v34 = vmul.f32 %v1284_v0, %v431_v45  ;;  %v438_v52 = vmul.f32 %v434_v3, %v423_v54 }
  0xb7   : > { %v487_v49 = vsub.f32 %v475_v44, %v481_v51  ;;  %v439_v46 = vmul.f32 %v1284_v0, %v423_v54 }
  0xb8   : > { %v448_v55 = vadd.f32 %v442_v53, %v1346_v62  ;;  %v449_v60 = vadd.f32 %v443_v34, %v420_v1  ;;  %v488_v10 = vsub.f32 %v476_v50, %v482_v57  ;;  %v379_v62 = vsel %vm376_vm0, %v377_v47, %v378_v38 }
  0xb9   : > { %588 = vxpose.xlu1.b32.start.end [1/1] (short) %v487_v49, 128  ;;  %v444_v1 = vadd.f32 %v438_v52, %v415_v4  ;;  %v445_v17 = vadd.f32 %v439_v46, %v416_v9  ;;  %v479_v16 = vmul.f32 0.5, %v379_v62 }
  0xbe   : > { %v452_v11 = vpop.permute.xlu1 %451 }
  0xbf   : > { %v467_v6 = vmul.f32 %v1367_v12, %v452_v11  ;;  %v468_v3 = vmul.f32 %v1374_v20, %v452_v11 }
  0xc1   : > { %v473_v0 = vadd.f32 %v467_v6, %v444_v1  ;;  %v474_v18 = vadd.f32 %v468_v3, %v445_v17 }
  0xc3   : > { %v486_v19 = vsub.f32 %v474_v18, %v480_v22  ;;  %v485_v23 = vsub.f32 %v473_v0, %v479_v16 }
  0xc5   : > { %523 = vxpose.xlu0.b32.start.end [1/1] (short) %v486_v19, 128  ;;  %491 = vxpose.xlu2.b32.start.end [1/1] (short) %v485_v23, 128 }
  0xc6   : > { %v460_v36 = vpop.permute.xlu1 %459 }
  0xc7   : > { %v471_v63 = vmul.f32 %v1367_v12, %v460_v36  ;;  %v472_v47 = vmul.f32 %v1374_v20, %v460_v36 }
  0xc9   : > { %v477_v5 = vadd.f32 %v471_v63, %v448_v55  ;;  %v478_v24 = vadd.f32 %v472_v47, %v449_v60 }
  0xcb   : > { %v490_v28 = vsub.f32 %v478_v24, %v484_v25  ;;  %v489_v29 = vsub.f32 %v477_v5, %v483_v27 }
 0x139   : > { %717 = vxpose.xlu1.b32.start.end [1/1] (short) %v490_v28, 128 }
 0x145   : > { %685 = vxpose.xlu0.b32.start.end [1/1] (short) %v489_v29, 128  ;;  %620 = vxpose.xlu2.b32.start.end [1/1] (short) %v488_v10, 128 }
 0x15d   : > { %v604_v12 = vpop.trf.xlu1 }
 0x15e   : > { %862 = vst.msk [vmem:[%s1441_s10 + $0x100] sm:$0xff] %vm555_vm9, %v604_v12  ;;  %v507_v56 = vpop.trf.xlu2 }
 0x15f   : > { %556 = vst.msk [vmem:[%s1441_s10] sm:$0xff] %vm555_vm9, %v507_v56 }
 0x165   : > { %v605_v20 = vpop.trf.xlu1 }
 0x166   : > { %863 = vst.msk [vmem:[%s1441_s10 + $0x108] sm:$0xff] %vm555_vm9, %v605_v20  ;;  %v508_v8 = vpop.trf.xlu2 }
 0x167   : > { %557 = vst.msk [vmem:[%s1441_s10 + $0x8] sm:$0xff] %vm555_vm9, %v508_v8 }
 0x169   : > { %v539_v30 = vpop.trf.xlu0 }
 0x16a   : > { %572 = vst.msk [vmem:[%s1441_s10 + $0x80] sm:$0xff] %vm555_vm9, %v539_v30 }
 0x16d   : > { %v606_v31 = vpop.trf.xlu1 }
 0x16e   : > { %864 = vst.msk [vmem:[%s1441_s10 + $0x110] sm:$0xff] %vm555_vm9, %v606_v31  ;;  %v509_v21 = vpop.trf.xlu2 }
 0x16f   : > { %558 = vst.msk [vmem:[%s1441_s10 + $0x10] sm:$0xff] %vm555_vm9, %v509_v21 }
 0x171   : > { %v540_v38 = vpop.trf.xlu0 }
 0x172   : > { %573 = vst.msk [vmem:[%s1441_s10 + $0x88] sm:$0xff] %vm555_vm9, %v540_v38 }
 0x175   : > { %v607_v33 = vpop.trf.xlu1 }
 0x176   : > { %865 = vst.msk [vmem:[%s1441_s10 + $0x118] sm:$0xff] %vm555_vm9, %v607_v33  ;;  %v510_v35 = vpop.trf.xlu2 }
 0x177   : > { %559 = vst.msk [vmem:[%s1441_s10 + $0x18] sm:$0xff] %vm555_vm9, %v510_v35 }
 0x179   : > { %v541_v37 = vpop.trf.xlu0 }
 0x17a   : > { %574 = vst.msk [vmem:[%s1441_s10 + $0x90] sm:$0xff] %vm555_vm9, %v541_v37 }
 0x17d   : > { %v608_v39 = vpop.trf.xlu1 }
 0x17e   : > { %866 = vst.msk [vmem:[%s1441_s10 + $0x120] sm:$0xff] %vm555_vm9, %v608_v39  ;;  %v511_v40 = vpop.trf.xlu2 }
 0x17f   : > { %560 = vst.msk [vmem:[%s1441_s10 + $0x20] sm:$0xff] %vm555_vm9, %v511_v40 }
 0x181   : > { %v542_v26 = vpop.trf.xlu0 }
 0x182   : > { %575 = vst.msk [vmem:[%s1441_s10 + $0x98] sm:$0xff] %vm555_vm9, %v542_v26 }
 0x185   : > { %v609_v42 = vpop.trf.xlu1 }
 0x186   : > { %867 = vst.msk [vmem:[%s1441_s10 + $0x128] sm:$0xff] %vm555_vm9, %v609_v42  ;;  %v512_v41 = vpop.trf.xlu2 }
 0x187   : > { %561 = vst.msk [vmem:[%s1441_s10 + $0x28] sm:$0xff] %vm555_vm9, %v512_v41 }
 0x189   : > { %v543_v32 = vpop.trf.xlu0 }
 0x18a   : > { %576 = vst.msk [vmem:[%s1441_s10 + $0xa0] sm:$0xff] %vm555_vm9, %v543_v32 }
 0x18d   : > { %v610_v14 = vpop.trf.xlu1 }
 0x18e   : > { %868 = vst.msk [vmem:[%s1441_s10 + $0x130] sm:$0xff] %vm555_vm9, %v610_v14  ;;  %v513_v15 = vpop.trf.xlu2 }
 0x18f   : > { %562 = vst.msk [vmem:[%s1441_s10 + $0x30] sm:$0xff] %vm555_vm9, %v513_v15 }
 0x191   : > { %v544_v43 = vpop.trf.xlu0 }
 0x192   : > { %577 = vst.msk [vmem:[%s1441_s10 + $0xa8] sm:$0xff] %vm555_vm9, %v544_v43 }
 0x195   : > { %v611_v51 = vpop.trf.xlu1 }
 0x196   : > { %869 = vst.msk [vmem:[%s1441_s10 + $0x138] sm:$0xff] %vm555_vm9, %v611_v51  ;;  %v514_v44 = vpop.trf.xlu2 }
 0x197   : > { %563 = vst.msk [vmem:[%s1441_s10 + $0x38] sm:$0xff] %vm555_vm9, %v514_v44 }
 0x199   : > { %v545_v45 = vpop.trf.xlu0 }
 0x19a   : > { %578 = vst.msk [vmem:[%s1441_s10 + $0xb0] sm:$0xff] %vm555_vm9, %v545_v45 }
 0x19d   : > { %v612_v48 = vpop.trf.xlu1 }
 0x19e   : > { %870 = vst.msk [vmem:[%s1441_s10 + $0x140] sm:$0xff] %vm555_vm9, %v612_v48  ;;  %v515_v50 = vpop.trf.xlu2 }
 0x19f   : > { %564 = vst.msk [vmem:[%s1441_s10 + $0x40] sm:$0xff] %vm555_vm9, %v515_v50 }
 0x1a1   : > { %v546_v53 = vpop.trf.xlu0 }
 0x1a2   : > { %579 = vst.msk [vmem:[%s1441_s10 + $0xb8] sm:$0xff] %vm555_vm9, %v546_v53 }
 0x1a5   : > { %v613_v34 = vpop.trf.xlu1 }
 0x1a6   : > { %871 = vst.msk [vmem:[%s1441_s10 + $0x148] sm:$0xff] %vm555_vm9, %v613_v34  ;;  %v516_v54 = vpop.trf.xlu2 }
 0x1a7   : > { %565 = vst.msk [vmem:[%s1441_s10 + $0x48] sm:$0xff] %vm555_vm9, %v516_v54 }
 0x1a9   : > { %v547_v57 = vpop.trf.xlu0 }
 0x1aa   : > { %580 = vst.msk [vmem:[%s1441_s10 + $0xc0] sm:$0xff] %vm555_vm9, %v547_v57 }
 0x1ac   : > { %991 = vset.pattern.permute.xlu0 %v1100_v7 }
 0x1ad   : > { %v614_v58 = vpop.trf.xlu1 }
 0x1ae   : > { %872 = vst.msk [vmem:[%s1441_s10 + $0x150] sm:$0xff] %vm555_vm9, %v614_v58  ;;  %v517_v59 = vpop.trf.xlu2 }
 0x1af   : > { %566 = vst.msk [vmem:[%s1441_s10 + $0x50] sm:$0xff] %vm555_vm9, %v517_v59 }
 0x1b1   : > { %v548_v49 = vpop.trf.xlu0 }
 0x1b2   : > { %581 = vst.msk [vmem:[%s1441_s10 + $0xc8] sm:$0xff] %vm555_vm9, %v548_v49 }
 0x1b5   : > { %v615_v55 = vpop.trf.xlu1 }
 0x1b6   : > { %873 = vst.msk [vmem:[%s1441_s10 + $0x158] sm:$0xff] %vm555_vm9, %v615_v55  ;;  %v518_v60 = vpop.trf.xlu2 }
 0x1b7   : > { %567 = vst.msk [vmem:[%s1441_s10 + $0x58] sm:$0xff] %vm555_vm9, %v518_v60 }
 0x1b9   : > { %v549_v7 = vpop.trf.xlu0 }
 0x1ba   : > { %582 = vst.msk [vmem:[%s1441_s10 + $0xd0] sm:$0xff] %vm555_vm9, %v549_v7 }
 0x1bd   : > { %v616_v10 = vpop.trf.xlu1 }
 0x1be   : > { %874 = vst.msk [vmem:[%s1441_s10 + $0x160] sm:$0xff] %vm555_vm9, %v616_v10  ;;  %v519_v61 = vpop.trf.xlu2 }
 0x1bf   : > { %568 = vst.msk [vmem:[%s1441_s10 + $0x60] sm:$0xff] %vm555_vm9, %v519_v61 }
 0x1c1   : > { %v550_v2 = vpop.trf.xlu0 }
 0x1c2   : > { %583 = vst.msk [vmem:[%s1441_s10 + $0xd8] sm:$0xff] %vm555_vm9, %v550_v2 }
 0x1c5   : > { %v617_v52 = vpop.trf.xlu1 }
 0x1c6   : > { %875 = vst.msk [vmem:[%s1441_s10 + $0x168] sm:$0xff] %vm555_vm9, %v617_v52  ;;  %v520_v46 = vpop.trf.xlu2 }
 0x1c7   : > { %569 = vst.msk [vmem:[%s1441_s10 + $0x68] sm:$0xff] %vm555_vm9, %v520_v46 }
 0x1c9   : > { %v551_v4 = vpop.trf.xlu0 }
 0x1ca   : > { %584 = vst.msk [vmem:[%s1441_s10 + $0xe0] sm:$0xff] %vm555_vm9, %v551_v4 }
 0x1cd   : > { %v618_v9 = vpop.trf.xlu1 }
 0x1ce   : > { %876 = vst.msk [vmem:[%s1441_s10 + $0x170] sm:$0xff] %vm555_vm9, %v618_v9  ;;  %v521_v11 = vpop.trf.xlu2 }
 0x1cf   : > { %570 = vst.msk [vmem:[%s1441_s10 + $0x70] sm:$0xff] %vm555_vm9, %v521_v11 }
 0x1d1   : > { %v552_v13 = vpop.trf.xlu0 }
 0x1d2   : > { %585 = vst.msk [vmem:[%s1441_s10 + $0xe8] sm:$0xff] %vm555_vm9, %v552_v13 }
 0x1d5   : > { %v619_v62 = vpop.trf.xlu1 }
 0x1d6   : > { %877 = vst.msk [vmem:[%s1441_s10 + $0x178] sm:$0xff] %vm555_vm9, %v619_v62  ;;  %v522_v1 = vpop.trf.xlu2 }
 0x1d7   : > { %571 = vst.msk [vmem:[%s1441_s10 + $0x78] sm:$0xff] %vm555_vm9, %v522_v1 }
 0x1d9   : > { %v553_v17 = vpop.trf.xlu0 }
 0x1da   : > { %586 = vst.msk [vmem:[%s1441_s10 + $0xf0] sm:$0xff] %vm555_vm9, %v553_v17 }
 0x1dd   : > { %v733_v6 = vpop.trf.xlu1 }
 0x1de   : > { %910 = vst.msk [vmem:[%s1441_s10 + $0x280] sm:$0xff] %vm555_vm9, %v733_v6  ;;  %v636_v3 = vpop.trf.xlu2 }
 0x1df   : > { %878 = vst.msk [vmem:[%s1441_s10 + $0x180] sm:$0xff] %vm555_vm9, %v636_v3 }
 0x1e1   : > { %v554_v0 = vpop.trf.xlu0 }
 0x1e2   : > { %587 = vst.msk [vmem:[%s1441_s10 + $0xf8] sm:$0xff] %vm555_vm9, %v554_v0 }
 0x1e5   : > { %v734_v18 = vpop.trf.xlu1 }
 0x1e6   : > { %911 = vst.msk [vmem:[%s1441_s10 + $0x288] sm:$0xff] %vm555_vm9, %v734_v18  ;;  %v637_v22 = vpop.trf.xlu2 }
 0x1e7   : > { %879 = vst.msk [vmem:[%s1441_s10 + $0x188] sm:$0xff] %vm555_vm9, %v637_v22 }
 0x1e9   : > { %v701_v16 = vpop.trf.xlu0 }
 0x1ea   : > { %894 = vst.msk [vmem:[%s1441_s10 + $0x200] sm:$0xff] %vm555_vm9, %v701_v16 }
 0x1ed   : > { %v735_v19 = vpop.trf.xlu1 }
 0x1ee   : > { %912 = vst.msk [vmem:[%s1441_s10 + $0x290] sm:$0xff] %vm555_vm9, %v735_v19  ;;  %v638_v23 = vpop.trf.xlu2 }
 0x1ef   : > { %880 = vst.msk [vmem:[%s1441_s10 + $0x190] sm:$0xff] %vm555_vm9, %v638_v23 }
 0x1f1   : > { %v702_v36 = vpop.trf.xlu0 }
 0x1f2   : > { %895 = vst.msk [vmem:[%s1441_s10 + $0x208] sm:$0xff] %vm555_vm9, %v702_v36 }
 0x1f5   : > { %v736_v63 = vpop.trf.xlu1 }
 0x1f6   : > { %913 = vst.msk [vmem:[%s1441_s10 + $0x298] sm:$0xff] %vm555_vm9, %v736_v63  ;;  %v639_v47 = vpop.trf.xlu2 }
 0x1f7   : > { %881 = vst.msk [vmem:[%s1441_s10 + $0x198] sm:$0xff] %vm555_vm9, %v639_v47 }
 0x1f9   : > { %v703_v5 = vpop.trf.xlu0 }
 0x1fa   : > { %896 = vst.msk [vmem:[%s1441_s10 + $0x210] sm:$0xff] %vm555_vm9, %v703_v5 }
 0x1fd   : > { %v737_v24 = vpop.trf.xlu1 }
 0x1fe   : > { %914 = vst.msk [vmem:[%s1441_s10 + $0x2a0] sm:$0xff] %vm555_vm9, %v737_v24  ;;  %v640_v25 = vpop.trf.xlu2 }
 0x1ff   : > { %882 = vst.msk [vmem:[%s1441_s10 + $0x1a0] sm:$0xff] %vm555_vm9, %v640_v25 }
 0x201   : > { %v704_v27 = vpop.trf.xlu0 }
 0x202   : > { %897 = vst.msk [vmem:[%s1441_s10 + $0x218] sm:$0xff] %vm555_vm9, %v704_v27 }
 0x205   : > { %v738_v28 = vpop.trf.xlu1 }
 0x206   : > { %915 = vst.msk [vmem:[%s1441_s10 + $0x2a8] sm:$0xff] %vm555_vm9, %v738_v28  ;;  %v641_v29 = vpop.trf.xlu2 }
 0x207   : > { %883 = vst.msk [vmem:[%s1441_s10 + $0x1a8] sm:$0xff] %vm555_vm9, %v641_v29 }
 0x209   : > { %v705_v12 = vpop.trf.xlu0 }
 0x20a   : > { %898 = vst.msk [vmem:[%s1441_s10 + $0x220] sm:$0xff] %vm555_vm9, %v705_v12 }
 0x20d   : > { %v739_v56 = vpop.trf.xlu1 }
 0x20e   : > { %916 = vst.msk [vmem:[%s1441_s10 + $0x2b0] sm:$0xff] %vm555_vm9, %v739_v56  ;;  %v642_v20 = vpop.trf.xlu2 }
 0x20f   : > { %884 = vst.msk [vmem:[%s1441_s10 + $0x1b0] sm:$0xff] %vm555_vm9, %v642_v20 }
 0x211   : > { %v706_v8 = vpop.trf.xlu0 }
 0x212   : > { %899 = vst.msk [vmem:[%s1441_s10 + $0x228] sm:$0xff] %vm555_vm9, %v706_v8 }
 0x215   : > { %v740_v30 = vpop.trf.xlu1 }
 0x216   : > { %917 = vst.msk [vmem:[%s1441_s10 + $0x2b8] sm:$0xff] %vm555_vm9, %v740_v30  ;;  %v643_v31 = vpop.trf.xlu2 }
 0x217   : > { %885 = vst.msk [vmem:[%s1441_s10 + $0x1b8] sm:$0xff] %vm555_vm9, %v643_v31 }
 0x219   : > { %v707_v21 = vpop.trf.xlu0 }
 0x21a   : > { %900 = vst.msk [vmem:[%s1441_s10 + $0x230] sm:$0xff] %vm555_vm9, %v707_v21 }
 0x21d   : > { %v741_v38 = vpop.trf.xlu1 }
 0x21e   : > { %918 = vst.msk [vmem:[%s1441_s10 + $0x2c0] sm:$0xff] %vm555_vm9, %v741_v38  ;;  %v644_v33 = vpop.trf.xlu2 }
 0x21f   : > { %886 = vst.msk [vmem:[%s1441_s10 + $0x1c0] sm:$0xff] %vm555_vm9, %v644_v33 }
 0x221   : > { %v708_v35 = vpop.trf.xlu0 }
 0x222   : > { %901 = vst.msk [vmem:[%s1441_s10 + $0x238] sm:$0xff] %vm555_vm9, %v708_v35 }
 0x225   : > { %v742_v37 = vpop.trf.xlu1 }
 0x226   : > { %919 = vst.msk [vmem:[%s1441_s10 + $0x2c8] sm:$0xff] %vm555_vm9, %v742_v37  ;;  %v645_v39 = vpop.trf.xlu2 }
 0x227   : > { %887 = vst.msk [vmem:[%s1441_s10 + $0x1c8] sm:$0xff] %vm555_vm9, %v645_v39 }
 0x229   : > { %v709_v40 = vpop.trf.xlu0 }
 0x22a   : > { %902 = vst.msk [vmem:[%s1441_s10 + $0x240] sm:$0xff] %vm555_vm9, %v709_v40 }
 0x22d   : > { %v743_v26 = vpop.trf.xlu1 }
 0x22e   : > { %920 = vst.msk [vmem:[%s1441_s10 + $0x2d0] sm:$0xff] %vm555_vm9, %v743_v26  ;;  %v646_v42 = vpop.trf.xlu2 }
 0x22f   : > { %888 = vst.msk [vmem:[%s1441_s10 + $0x1d0] sm:$0xff] %vm555_vm9, %v646_v42 }
 0x231   : > { %v710_v41 = vpop.trf.xlu0 }
 0x232   : > { %903 = vst.msk [vmem:[%s1441_s10 + $0x248] sm:$0xff] %vm555_vm9, %v710_v41 }
 0x235   : > { %v744_v32 = vpop.trf.xlu1 }
 0x236   : > { %921 = vst.msk [vmem:[%s1441_s10 + $0x2d8] sm:$0xff] %vm555_vm9, %v744_v32  ;;  %v647_v14 = vpop.trf.xlu2 }
 0x237   : > { %889 = vst.msk [vmem:[%s1441_s10 + $0x1d8] sm:$0xff] %vm555_vm9, %v647_v14 }
 0x239   : > { %v711_v15 = vpop.trf.xlu0 }
 0x23a   : > { %904 = vst.msk [vmem:[%s1441_s10 + $0x250] sm:$0xff] %vm555_vm9, %v711_v15 }
 0x23d   : > { %v745_v43 = vpop.trf.xlu1 }
 0x23e   : > { %922 = vst.msk [vmem:[%s1441_s10 + $0x2e0] sm:$0xff] %vm555_vm9, %v745_v43  ;;  %v648_v51 = vpop.trf.xlu2 }
 0x23f   : > { %890 = vst.msk [vmem:[%s1441_s10 + $0x1e0] sm:$0xff] %vm555_vm9, %v648_v51 }
 0x241   : > { %v712_v44 = vpop.trf.xlu0 }
 0x242   : > { %905 = vst.msk [vmem:[%s1441_s10 + $0x258] sm:$0xff] %vm555_vm9, %v712_v44 }
 0x245   : > { %v746_v45 = vpop.trf.xlu1 }
 0x246   : > { %923 = vst.msk [vmem:[%s1441_s10 + $0x2e8] sm:$0xff] %vm555_vm9, %v746_v45  ;;  %v649_v48 = vpop.trf.xlu2 }
 0x247   : > { %891 = vst.msk [vmem:[%s1441_s10 + $0x1e8] sm:$0xff] %vm555_vm9, %v649_v48 }
 0x249   : > { %v713_v50 = vpop.trf.xlu0 }
 0x24a   : > { %906 = vst.msk [vmem:[%s1441_s10 + $0x260] sm:$0xff] %vm555_vm9, %v713_v50 }
 0x24d   : > { %v747_v53 = vpop.trf.xlu1 }
 0x24e   : > { %924 = vst.msk [vmem:[%s1441_s10 + $0x2f0] sm:$0xff] %vm555_vm9, %v747_v53  ;;  %v650_v34 = vpop.trf.xlu2 }
 0x24f   : > { %892 = vst.msk [vmem:[%s1441_s10 + $0x1f0] sm:$0xff] %vm555_vm9, %v650_v34 }
 0x251   : > { %v714_v54 = vpop.trf.xlu0 }
 0x252   : > { %907 = vst.msk [vmem:[%s1441_s10 + $0x268] sm:$0xff] %vm555_vm9, %v714_v54 }
 0x255   : > { %v748_v57 = vpop.trf.xlu1 }
 0x256   : > { %925 = vst.msk [vmem:[%s1441_s10 + $0x2f8] sm:$0xff] %vm555_vm9, %v748_v57  ;;  %v651_v58 = vpop.trf.xlu2 }
 0x257   : > { %893 = vst.msk [vmem:[%s1441_s10 + $0x1f8] sm:$0xff] %vm555_vm9, %v651_v58 }
 0x259   : > { %v715_v59 = vpop.trf.xlu0 }
 0x25a   : > { %908 = vst.msk [vmem:[%s1441_s10 + $0x270] sm:$0xff] %vm555_vm9, %v715_v59 }
 0x261   : > { %v716_v49 = vpop.trf.xlu0 }
 0x262   : > { %909 = vst.msk [vmem:[%s1441_s10 + $0x278] sm:$0xff] %vm555_vm9, %v716_v49 }
 0x263 PF: > { %p13_p7 = scmp.ge.s32.totalorder %s1143_s17, 4   ;;  %s1669_s12 = smov %s1084_s13 }
 0x264   : > { %s1670_s13 = smov %s1088_s14  ;;  %s1671_s14 = smov %s1153_s20 }
 0x265   : > { %s1672_s15 = smov %s1143_s17  ;;  %15 = sbr.rel (!%p13_p7) target bundleno = 3 (0x3), region = 75 }
 0x26a   :  { %803 = vsyncpa [#allocation3], 1 }
 0x26b   :  { %805 = vsyncpa [#allocation3 + $0x1], 1 }

</bundles_post_ra>
